<compile_context>
chip_gen: v7x
topology: tpu7x:2x2x1
jax: 0.10.0
libtpu: 0.0.40
codegen_flags: <defaults>
</compile_context>

<pallas_src>
import functools

import jax
import jax.numpy as jnp
from jax.experimental import pallas as pl
from jax.experimental.pallas import tpu as pltpu


# ----------------------------------------------------------------------------
# Pallas kernels: quantized linear (+ optional fused ReLU)
# ----------------------------------------------------------------------------
def _qlinear_kernel(scalars_ref, x_ref, w_ref, o_ref, *, apply_relu):
    """Full-K tile: output tile computed and written exactly once.

    scalars_ref : SMEM f32[2] = [w_scale, w_min]
    x_ref       : (tm, K)  bf16 pre-quantized activations (integer values 0..127)
    w_ref       : (K, tn)  int8 4-bit-quantized weights (values -8..7)
    o_ref       : (tm, tn) bf16 output tile
    """
    acc = jnp.dot(x_ref[...], w_ref[...].astype(jnp.bfloat16),
                  preferred_element_type=jnp.float32)
    out = acc * scalars_ref[0] + scalars_ref[1]
    if apply_relu:
        out = jnp.maximum(out, 0.0)
    o_ref[...] = out.astype(o_ref.dtype)


def _qlinear_kernel_ktiled(scalars_ref, x_ref, w_ref, o_ref, acc_ref, *, apply_relu):
    """K-tiled fallback: f32 accumulator scratch, affine+ReLU epilogue on last K."""
    k = pl.program_id(2)

    @pl.when(k == 0)
    def _():
        acc_ref[...] = jnp.zeros_like(acc_ref)

    acc_ref[...] += jnp.dot(x_ref[...], w_ref[...].astype(jnp.bfloat16),
                            preferred_element_type=jnp.float32)

    @pl.when(k == pl.num_programs(2) - 1)
    def _():
        out = acc_ref[...] * scalars_ref[0] + scalars_ref[1]
        if apply_relu:
            out = jnp.maximum(out, 0.0)
        o_ref[...] = out.astype(o_ref.dtype)


# ----------------------------------------------------------------------------
# VMEM-budget-aware tiling
# ----------------------------------------------------------------------------
def _vmem_capacity_bytes():
    try:
        return int(pltpu.get_tpu_info().vmem_capacity_bytes)
    except Exception:
        return 64 * 1024 * 1024  # assume the most restrictive generation (v7x)


def _divisor_tile(dim, candidates):
    for c in candidates:
        if c <= dim and dim % c == 0:
            return c
    return dim  # full extent is always a legal block size


def _choose_tiling(B, K, N, x_bytes, w_bytes, o_bytes, budget, force_k_tile=None):
    # M: full batch when small so every weight tile is DMA'd from HBM exactly once.
    tm = B if B <= 512 else _divisor_tile(B, (512, 256, 128, 64, 32, 16, 8))
    n_blocks_m = pl.cdiv(B, tm)

    # N: wide (lane-dense) tiles, but expose >=2 blocks on this parallel axis when
    # the M axis has a single block so both TensorCores of a v7x chip get work.
    n_cands = [c for c in (1024, 512, 256, 128) if c <= N and N % c == 0]
    if not n_cands or (N not in n_cands and N <= 1024):
        n_cands = [N] + n_cands
    if n_blocks_m == 1:
        split = [c for c in n_cands if N // c >= 2]
        n_cands = split + [c for c in n_cands if c not in split]

    # K: prefer full K (no accumulator scratch / output revisits); tile otherwise.
    if force_k_tile is not None:
        k_cands = [force_k_tile]
    else:
        k_cands = [K] + [c for c in (4096, 2048, 1024, 512, 256)
                         if c < K and K % c == 0]

    for tk in k_cands:
        k_tiled = tk != K
        for tn in n_cands:
            working_set = (2 * tm * tk * x_bytes        # double-buffered x tiles
                           + 2 * tk * tn * w_bytes      # double-buffered int8 W
                           + 2 * tm * tn * o_bytes      # double-buffered outputs
                           + (tm * tn * 4 if k_tiled else 0))  # f32 accumulator
            if working_set <= budget:
                return tm, tn, tk, k_tiled
    return tm, n_cands[-1], k_cands[-1], k_cands[-1] != K


# ----------------------------------------------------------------------------
# Activation quantization (fast_linear's x_int8), hoisted to the wrapper
# ----------------------------------------------------------------------------
def quantize_activations(x):
    """Per-tensor activation quantization from fast_linear (values 0..127).

    Global min/max are whole-tensor reductions, so they are computed here rather
    than inside the tiled kernel. The degenerate constant-input case
    (x.max() == x.min(), a divide-by-zero / NaN in the torch original) is guarded.
    """
    x = x.astype(jnp.float32)
    x_min = jnp.min(x)
    x_max = jnp.max(x)
    inv_scale = jnp.where(x_max > x_min, 127.0 / (x_max - x_min), 0.0)
    return jnp.round((x - x_min) * inv_scale)


# ----------------------------------------------------------------------------
# fast_linear wrapper
# ----------------------------------------------------------------------------
def fast_linear(x, w_q_i8, w_scale, w_min, *, apply_relu, force_k_tile=None):
    """FastQuantizedModel.fast_linear (+ optional fused following nn.ReLU)."""
    B, K = x.shape
    K2, N = w_q_i8.shape
    assert K == K2, "fast_linear does x @ W with no transpose (square Linear)"

    # Pre-quantized activations: integer values 0..127 are exact in bf16, so bf16
    # storage halves the activation DMA with zero accuracy loss.
    x_q = quantize_activations(x).astype(jnp.bfloat16)
    scalars = jnp.stack([jnp.asarray(w_scale, jnp.float32),
                         jnp.asarray(w_min, jnp.float32)]).astype(jnp.float32)

    vmem_cap = _vmem_capacity_bytes()
    budget = int(vmem_cap * 0.55)
    tm, tn, tk, k_tiled = _choose_tiling(B, K, N, 2, 1, 2, budget, force_k_tile)

    out_shape = jax.ShapeDtypeStruct((B, N), jnp.bfloat16)
    smem_spec = pl.BlockSpec(memory_space=pltpu.MemorySpace.SMEM)

    if not k_tiled:
        kernel = functools.partial(_qlinear_kernel, apply_relu=apply_relu)
        grid_spec = pltpu.PrefetchScalarGridSpec(
            num_scalar_prefetch=0,
            grid=(pl.cdiv(B, tm), pl.cdiv(N, tn)),
            in_specs=[
                smem_spec,                                        # [w_scale, w_min]
                pl.BlockSpec((tm, K), lambda i, j: (i, 0)),       # x_q (bf16)
                pl.BlockSpec((K, tn), lambda i, j: (0, j)),       # W_q (int8)
            ],
            out_specs=pl.BlockSpec((tm, tn), lambda i, j: (i, j)),
        )
        semantics = ("parallel", "parallel")
    else:
        kernel = functools.partial(_qlinear_kernel_ktiled, apply_relu=apply_relu)
        grid_spec = pltpu.PrefetchScalarGridSpec(
            num_scalar_prefetch=0,
            grid=(pl.cdiv(B, tm), pl.cdiv(N, tn), K // tk),
            in_specs=[
                smem_spec,
                pl.BlockSpec((tm, tk), lambda i, j, k: (i, k)),   # x_q tile
                pl.BlockSpec((tk, tn), lambda i, j, k: (k, j)),   # W_q tile
            ],
            out_specs=pl.BlockSpec((tm, tn), lambda i, j, k: (i, j)),
            scratch_shapes=[pltpu.VMEM((tm, tn), jnp.float32)],
        )
        semantics = ("parallel", "parallel", "arbitrary")

    return pl.pallas_call(
        kernel,
        out_shape=out_shape,
        grid_spec=grid_spec,
        compiler_params=pltpu.CompilerParams(
            dimension_semantics=semantics,
            vmem_limit_bytes=int(vmem_cap * 0.75),
        ),
    )(scalars, x_q, w_q_i8)


# ----------------------------------------------------------------------------
# Parameter setup (plain JAX glue) — mirrors quantize_model / quantize_tensor
# ----------------------------------------------------------------------------
def quantize_tensor(t):
    """4-bit weight quantization exactly as FastQuantizedModel.quantize_tensor."""
    min_val = jnp.min(t)
    max_val = jnp.max(t)
    scale = (max_val - min_val) / 15.0
    q = jnp.clip(jnp.round((t - min_val) / scale), 0.0, 15.0) - 8.0
    return q.astype(jnp.int8), scale, min_val


def build_quantized_mlp(key, hidden):
    """Weights for the two square Linear layers, then 4-bit quantize them.

    Weights are intentionally left-skewed: with symmetric (Gaussian) weights the
    torch-style affine "dequant" in fast_linear drives every pre-ReLU output
    negative, the intermediate collapses to all zeros, and the next layer's
    activation quantization hits 0/0 — the demo would only compare NaNs.
    """
    layers = []
    for k in jax.random.split(key, 2):
        u = jax.random.uniform(k, (hidden, hidden), dtype=jnp.float32)
        w = 0.05 - 0.15 * u * u
        q, scale, min_val = quantize_tensor(w)
        layers.append((q, scale, min_val))  # W_q stays int8 in HBM
    return layers


def fast_quantized_forward(x, layers):
    """FastQuantizedModel.forward: fast_linear -> ReLU -> fast_linear -> ReLU.

    The two layers are separate pallas_calls: fusing them would require a global
    min/max over layer-1's output (a cross-grid reduction) before layer-2's
    activation quantization, so the bf16 intermediate makes one HBM round trip.
    """
    for w_q_i8, scale, min_val in layers:
        x = fast_linear(x, w_q_i8, scale, min_val, apply_relu=True)
    return x


# ----------------------------------------------------------------------------
# Pure-JAX reference (same math, no Pallas) for a sanity check
# ----------------------------------------------------------------------------
def _reference_layer(x, w_q_i8, scale, min_val, *, apply_relu):
    x_q = quantize_activations(x)
    out = jnp.dot(x_q, w_q_i8.astype(jnp.float32),
                  preferred_element_type=jnp.float32) * scale + min_val
    if apply_relu:
        out = jnp.maximum(out, 0.0)
    # Mirror the kernel pipeline's bf16 inter-layer activation storage.
    return out.astype(jnp.bfloat16)


def reference_forward(x, layers):
    for w_q_i8, scale, min_val in layers:
        x = _reference_layer(x, w_q_i8, scale, min_val, apply_relu=True)
    return x


if __name__ == "__main__":
    B, H = 16, 512
    key = jax.random.PRNGKey(0)
    k_x, k_w = jax.random.split(key)

    x = jax.random.normal(k_x, (B, H), dtype=jnp.float32)
    layers = build_quantized_mlp(k_w, H)

    # Full two-layer forward: full-K single-shot tiles, grid exposes >=2 parallel
    # N blocks so a v7x chip keeps both TensorCores busy.
    out = jax.block_until_ready(fast_quantized_forward(x, layers))
    ref = reference_forward(x, layers)
    assert out.shape == (B, H) and out.dtype == jnp.bfloat16
    assert jnp.allclose(out.astype(jnp.float32), ref.astype(jnp.float32),
                        rtol=2e-2, atol=1e-2), "mismatch vs reference (pipeline)"
    assert bool(jnp.any(out > 0)), "degenerate all-zero output"

    # Also exercise the K-tiled accumulator fallback path on a single layer.
    w_q0, s0, m0 = layers[0]
    out_k = jax.block_until_ready(
        fast_linear(x, w_q0, s0, m0, apply_relu=True, force_k_tile=128))
    ref_k = _reference_layer(x, w_q0, s0, m0, apply_relu=True)
    assert jnp.allclose(out_k.astype(jnp.float32), ref_k.astype(jnp.float32),
                        rtol=2e-2, atol=1e-2), "mismatch vs reference (K-tiled)"

    print("KERNEL_OK")
</pallas_src>

<mosaic_0001>
module attributes {stable_mosaic.version = 11 : i64} {
  func.func @_qlinear_kernel(%arg0: i32, %arg1: i32, %arg2: memref<2xf32, #tpu.memory_space<smem>>, %arg3: memref<16x512xbf16, #tpu.memory_space<vmem>>, %arg4: memref<512x256xi8, #tpu.memory_space<vmem>>, %arg5: memref<16x256xbf16, #tpu.memory_space<vmem>>) attributes {dimension_semantics = [#tpu.dimension_semantics<parallel>, #tpu.dimension_semantics<parallel>], iteration_bounds = array<i64: 1, 2>, scalar_prefetch = 0 : i64, scratch_operands = 0 : i64, tpu.core_type = #tpu.core_type<tc>, window_params = [{transform_indices = @transform_0, window_bounds = array<i64: 2>}, {transform_indices = @transform_1, window_bounds = array<i64: 16, 512>}, {transform_indices = @transform_2, window_bounds = array<i64: 512, 256>}, {transform_indices = @transform_3, window_bounds = array<i64: 16, 256>}]} {
    %c0 = arith.constant 0 : index
    %c0_0 = arith.constant 0 : index
    %0 = vector.load %arg3[%c0, %c0_0] : memref<16x512xbf16, #tpu.memory_space<vmem>>, vector<16x512xbf16>
    %c0_1 = arith.constant 0 : index
    %c0_2 = arith.constant 0 : index
    %1 = vector.load %arg4[%c0_1, %c0_2] : memref<512x256xi8, #tpu.memory_space<vmem>>, vector<512x256xi8>
    %2 = arith.sitofp %1 : vector<512x256xi8> to vector<512x256xbf16>
    %cst = arith.constant dense<0.000000e+00> : vector<16x256xf32>
    %3 = tpu.matmul %0, %2, %cst {dimension_numbers = #tpu.dot_dimension_numbers<[1], [0], [0], [1], [0, 0, 1, 1], [], []>} : vector<16x512xbf16>, vector<512x256xbf16>, vector<16x256xf32> -> vector<16x256xf32>
    %c0_3 = arith.constant 0 : index
    %4 = memref.load %arg2[%c0_3] : memref<2xf32, #tpu.memory_space<smem>>
    %5 = vector.broadcast %4 : f32 to vector<16x256xf32>
    %6 = arith.mulf %3, %5 : vector<16x256xf32>
    %c1 = arith.constant 1 : index
    %7 = memref.load %arg2[%c1] : memref<2xf32, #tpu.memory_space<smem>>
    %8 = vector.broadcast %7 : f32 to vector<16x256xf32>
    %9 = arith.addf %6, %8 : vector<16x256xf32>
    %cst_4 = arith.constant 0.000000e+00 : f32
    %10 = vector.broadcast %cst_4 : f32 to vector<16x256xf32>
    %11 = arith.maximumf %9, %10 : vector<16x256xf32>
    %12 = arith.truncf %11 : vector<16x256xf32> to vector<16x256xbf16>
    %c0_5 = arith.constant 0 : index
    %c0_6 = arith.constant 0 : index
    %13 = vector.load %arg5[%c0_5, %c0_6] : memref<16x256xbf16, #tpu.memory_space<vmem>>, vector<16x256xbf16>
    tpu.vector_store %arg5[%c0_5, %c0_6], %12 {strides = array<i32>} : memref<16x256xbf16, #tpu.memory_space<vmem>>, vector<16x256xbf16>,
    return
  }
  func.func @transform_0(%arg0: i32, %arg1: i32) -> i32 {
    %c0_i32 = arith.constant 0 : i32
    %c0_i32_0 = arith.constant 0 : i32
    return %c0_i32 : i32
  }
  func.func @transform_1(%arg0: i32, %arg1: i32) -> (i32, i32) {
    %c0_i32 = arith.constant 0 : i32
    %c0_i32_0 = arith.constant 0 : i32
    return %arg0, %c0_i32 : i32, i32
  }
  func.func @transform_2(%arg0: i32, %arg1: i32) -> (i32, i32) {
    %c0_i32 = arith.constant 0 : i32
    %c0_i32_0 = arith.constant 0 : i32
    return %c0_i32, %arg1 : i32, i32
  }
  func.func @transform_3(%arg0: i32, %arg1: i32) -> (i32, i32) {
    %c0_i32 = arith.constant 0 : i32
    return %arg0, %arg1 : i32, i32
  }
}

</mosaic_0001>

<bundles_post_ra>
// kernel: tpu_custom_call.1
= control target key start
LH: loop header
LB: loop body
LE: loop exit
PB: predicated region body
PF: predicated region fallthrough
CT: control target
= control target key end

     0   :  { %8 = vsyncpa [#allocation5], 0  ;;  %s1211_s0 = inlined_call_operand.hbm [shape: f32[2], index: 0, kind: input, shape index: {}]   ;;  %s1212_s1 = inlined_call_operand.hbm [shape: bf16[16,512], index: 1, kind: input, shape index: {}]   ;;  %s1213_s2 = inlined_call_operand.hbm [shape: s8[512,512], index: 2, kind: input, shape index: {}]   ;;  %s1214_s3 = inlined_call_operand.hbm [shape: bf16[16,512], index: 3, kind: output, shape index: {}]  }
   0x1   :  { %9 = vsyncpa [#allocation3], 0 }
   0x2   :  { %10 = vsyncpa [#allocation8], 0 }
   0x3   :  { %12 = vsyncpa [#allocation8 + $0x1], 0 }
   0x4   :  { %13 = vsyncpa [#allocation4], 0 }
   0x5   :  { %15 = vsyncpa [#allocation4 + $0x1], 0  ;;  %s928_s12 = smov 0   ;;  %s930_s13 = smov 0  }
   0x6   :  { %s932_s14 = smov 0   ;;  %s934_s15 = smov 0  }
   0x7   :  { %s936_s16 = smov 0   ;;  %s938_s17 = smov 0  }
   0x8 LB: > { %s606_s18 = sadd.s32 4294967295, %s896_s17   ;;  %s607_s19 = sadd.s32 4294967294, %s896_s17   ;;  %s896_s17 = sphi %s938_s17, %s21_s17   ;;  %s892_s16 = sphi %s936_s16, %s1238_s16   ;;  %s888_s15 = sphi %s934_s15, %s1237_s15   ;;  %s884_s14 = sphi %s932_s14, %s1236_s14   ;;  %s880_s13 = sphi %s930_s13, %s1235_s13   ;;  %s876_s12 = sphi %s928_s12, %s1234_s12  }
   0x9   : > { %s87_s20 = sadd.s32 1, %s884_s14  ;;  %p94_p0 = scmp.ne.s32.totalorder %s884_s14, %s880_s13 }
   0xa   : > { %p95_p1 = scmp.eq.s32.totalorder %s896_s17, 0  ;;  %p100_p2 = scmp.ne.s32.totalorder %s880_s13, %s876_s12 }
   0xb   : > { %p966_p3 = scmp.eq.s32.totalorder %s606_s18, 0  ;;  %p126_p4 = scmp.eq.s32.totalorder %s606_s18, 1 }
   0xc   : > { %p96_p5 = por %p95_p1, %p94_p0  ;;  %p132_p6 = scmp.eq.s32.totalorder %s607_s19, 1 }
   0xd   : > { %s1220_s21 = scalar_select %p966_p3, 1, 0 }
   0xe   : > { %p972_p7 = por %p966_p3, %p100_p2  ;;  %p976_p8 = por %p126_p4, %p94_p0 }
   0xf   : > { %p980_p9 = por %p132_p6, %p100_p2  ;;  %p608_p10 = scmp.ge.s32.totalorder %s896_s17, 1 }
  0x10   : > { %s1221_s22 = scalar_select %p972_p7, 1, 0 }
  0x11   : > { %s1222_s23 = scalar_select %p976_p8, 1, 0 }
  0x12   : > { %s1223_s24 = scalar_select %p980_p9, 1, 0 }
  0x13   : > { %p139_p11 = scmp.lt.s32.totalorder %s896_s17, 3  ;;  %p669_p1 = scmp.lt.s32.totalorder %s896_s17, 2 }
  0x14   : > { %s898_s27 = smov [#allocation6]   ;;  %p1226_p0 = scmp.ne.s32.totalorder %s1220_s21, 0 }
  0x15   : > { %p987_p13 = pnand %p608_p10, %p139_p11  ;;  %p994_p7 = pnand %p669_p1, %p96_p5 }
  0x16   : > { %s164_s28 = sshll.u32 %s898_s27, 4  ;;  %s735_s5 = scalar_lea.hbm %s1211_s0, 16  ;;  %s1004_s28 = int_to_ptr.vmem [resolvable:$true] %s164_s28 }
  0x17   : > { %p652_p3 = pneg %p987_p13  ;;  %p736_p4 = scmp.ne.s32.totalorder %s1211_s0, %s735_s5 }
  0x18   : > { %p742_p10 = scmp.lt.u32.totalorder %s735_s5, %s1211_s0 }
  0x19   : > { %p1000_p2 = pnand %p652_p3, %p1226_p0 }
  0x1b   : > { %p737_p5 = pneg %p1000_p2 }
  0x1d   : > { %p738_p3 = pnand %p737_p5, %p736_p4 }
  0x1f   : > { %p739_p6 = pneg %p738_p3 }
  0x21   : > { %p744_p11 = pnand %p742_p10, %p739_p6 }
  0x23   : > { %747 = shalt.err (!%p744_p11)
}
  0x24   : > { %s899_s10 = smov [#allocation2]   ;;  %s748_s30 = scalar_lea.hbm %s1212_s1, 512 }
  0x25   : > { %655 = dma.hbm_to_smem (!%p1000_p2), %s1211_s0, 16, %s899_s10, [#allocation5]  }
  0x26   : > { %p749_p1 = scmp.ne.s32.totalorder %s1212_s1, %s748_s30  ;;  %p755_p3 = scmp.lt.u32.totalorder %s748_s30, %s1212_s1 }
  0x28   : > { %p751_p0 = pnand %p749_p1, %p737_p5 }
  0x2a   : > { %p752_p4 = pneg %p751_p0 }
  0x2c   : > { %p757_p6 = pnand %p755_p3, %p752_p4 }
  0x2e   : > { %760 = shalt.err (!%p757_p6)
}
  0x2f   : > { %s761_s8 = scalar_lea.vmem %s1004_s28, 512  ;;  %p769_p9 = scmp.lt.s32.totalorder %s1004_s28, %s1004_s28 }
  0x30   : > { %p762_p10 = scmp.ne.s32.totalorder %s1004_s28, %s761_s8  ;;  %p770_p1 = scmp.lt.s32.totalorder %s761_s8, %s761_s8 }
  0x32   : > { %p764_p11 = pnand %p762_p10, %p737_p5  ;;  %p771_p0 = por %p770_p1, %p769_p9 }
  0x34   : > { %p765_p12 = pneg %p764_p11 }
  0x36   : > { %p772_p8 = pnand %p771_p0, %p765_p12 }
  0x38   : > { %775 = shalt.err (!%p772_p8)
}
  0x39   : > { %s1219_s9 = smov 256   ;;  %s901_s10 = smov 16  }
  0x3a   : > { %658 = dma.hbm_to_vmem [thread:$0]  (!%p1000_p2), %s1212_s1, 512, %s1004_s28, [#allocation3], %s1219_s9, %s1219_s9, %s901_s10  }
  0x3b   : > { %s30_s19 = sadd.s32 1, %s892_s16  ;;  %s178_s27 = sand.u32 1, %s884_s14  }
  0x3c   : > { %p31_p8 = scmp.ge.s32.totalorder %s30_s19, 2  ;;  %s612_s30 = sshll.u32 %s178_s27, 8 }
  0x3d   : > { %s632_s4 = sshll.u32 %s892_s16, 8  ;;  %s182_s28 = scalar_lea.vmem [#allocation7], %s612_s30 }
  0x3e   : > { %s1240_s19 = smov (%p31_p8, %s30_s19), 0  ;;  %s1061_s29 = scalar_lea.hbm %s1213_s2, %s632_s4 }
  0x3f   : > { %s84_s7 = ssub.s32 %s892_s16, %s1240_s19  ;;  %s189_s8 = sshll.u32 %s182_s28, 4  ;;  %s1065_s8 = int_to_ptr.vmem [resolvable:$true] %s189_s8 }
  0x40   : > { %p85_p9 = scmp.eq.s32.totalorder %s84_s7, 0  ;;  %s1072_s18 = scalar_lea.sflag [#allocation8], %s178_s27 }
  0x41   : > { %s776_s9 = scalar_lea.hbm %s1061_s29, 4096  ;;  %p778_p2 = pneg %p994_p7 }
  0x42   : > { %s1070_s11 = scalar_select %p85_p9, %s884_s14, %s87_s20  }
  0x43   : > { %p777_p12 = scmp.ne.s32.totalorder %s1061_s29, %s776_s9  ;;  %s781_s30 = scalar_lea.hbm %s1213_s2, 8192 }
  0x44   : > { %p782_p3 = scmp.lt.u32.totalorder %s1061_s29, %s1213_s2  ;;  %p783_p6 = scmp.lt.u32.totalorder %s781_s30, %s776_s9 }
  0x45   : > { %p779_p5 = pnand %p778_p2, %p777_p12  ;;  %p785_p11 = scmp.lt.u32.totalorder %s776_s9, %s1061_s29 }
  0x46   : > { %p784_p10 = por %p783_p6, %p782_p3 }
  0x47   : > { %p780_p4 = pneg %p779_p5 }
  0x48   : > { %p786_p1 = por %p785_p11, %p784_p10 }
  0x4a   : > { %p787_p0 = pnand %p786_p1, %p780_p4 }
  0x4c   : > { %790 = shalt.err (!%p787_p0)
}
  0x4d   : > { %s791_s20 = scalar_lea.vmem %s1065_s8, 4096  ;;  %s902_s27 = smov [#allocation7]  }
  0x4e   : > { %p792_p8 = scmp.ne.s32.totalorder %s1065_s8, %s791_s20  ;;  %s796_s28 = sshll.u32 %s902_s27, 4  ;;  %s797_s28 = int_to_ptr.vmem [resolvable:$false] %s796_s28 }
  0x4f   : > { %s798_s4 = scalar_lea.vmem %s797_s28, 8192  ;;  %p799_p5 = scmp.lt.s32.totalorder %s1065_s8, %s797_s28 }
  0x50   : > { %p794_p9 = pnand %p792_p8, %p778_p2  ;;  %p800_p3 = scmp.lt.s32.totalorder %s798_s4, %s791_s20 }
  0x52   : > { %p795_p12 = pneg %p794_p9  ;;  %p801_p6 = por %p800_p3, %p799_p5 }
  0x54   : > { %p802_p10 = pnand %p801_p6, %p795_p12 }
  0x56   : > { %805 = shalt.err (!%p802_p10)
}
  0x57   : > { %s903_s9 = smov 512   ;;  %s1228_s6 = smov 256  }
  0x58   : > { %662 = dma.hbm_to_vmem [thread:$0]  (!%p994_p7), %s1061_s29, 4096, %s1065_s8, %s1072_s18, %s903_s9, %s1228_s6, %s901_s10  }
  0x59   : > { %201 = sbr.rel (%p987_p13) target bundleno = 414 (0x19e), region = 32  ;;  %p1229_p2 = scmp.ne.s32.totalorder (!%p987_p13), %s1220_s21, 0 }
  0x60   : > { %859 = dma.done.wait (%p1229_p2), [#allocation5], 16  }
  0x61   : > { %861 = vsyncadd (%p1229_p2), [#allocation5], 4294967280 }
  0x62   : > { %863 = dma.done.wait (%p1229_p2), [#allocation3], 512  }
  0x63   : > { %865 = vsyncadd (%p1229_p2), [#allocation3], 4294966784  ;;  %s1113_s26 = sand.u32 1, %s880_s13   ;;  %p1230_p7 = scmp.ne.s32.totalorder %s1221_s22, 0 }
  0x64   : > { %s618_s25 = sshll.u32 %s1113_s26, 8  ;;  %s212_s10 = scalar_lea.sflag [#allocation8], %s1113_s26 }
  0x65   : > { %s1117_s29 = scalar_lea.vmem [#allocation7], %s618_s25 }
  0x66   : > { %867 = dma.done.wait (%p1230_p7), %s212_s10, 4096  }
  0x67   : > { %869 = vsyncadd (%p1230_p7), %s212_s10, 4294963200 }
  0x68   : > { %220 = sfence }
  0x69   : > { %v248_v0 = vld [vmem:[%s1117_s29 + $0x8] sm:$0xff]  ;;  %v247_v2 = vld [vmem:[%s1117_s29] sm:$0xff]  ;;  %v250_v10 = vld [vmem:[%s1117_s29 + $0x18] sm:$0xff]  ;;  %s449_s21 = sld [smem:[#allocation2]]  ;;  %s624_s22 = sld [smem:[#allocation2 + $0x1]] }
  0x6a   : > { %v264_v1 = vld [vmem:[%s1117_s29 + $0x88] sm:$0xff]  ;;  %v280_v3 = vunpack.c.l.s8.bf16 %v248_v0  ;;  %v282_v4 = vunpack.c.h.s8.bf16 %v248_v0  ;;  %v263_v7 = vld [vmem:[%s1117_s29 + $0x80] sm:$0xff]  ;;  %v279_v8 = vunpack.c.l.s8.bf16 %v247_v2  ;;  %v266_v11 = vld [vmem:[%s1117_s29 + $0x98] sm:$0xff]  ;;  %v281_v12 = vunpack.c.h.s8.bf16 %v247_v2  ;;  %s619_s8 = sshll.u32 %s1113_s26, 4  ;;  %s635_s5 = sshll.u32 %s888_s15, 7 }
  0x6b   : > { %v312_v5 = vunpack.c.l.s8.bf16 %v264_v1  ;;  %v314_v6 = vunpack.c.h.s8.bf16 %v264_v1  ;;  %v311_v9 = vunpack.c.l.s8.bf16 %v263_v7  ;;  %v313_v13 = vunpack.c.h.s8.bf16 %v263_v7  ;;  %v249_v16 = vld [vmem:[%s1117_s29 + $0x10] sm:$0xff]  ;;  %v252_v22 = vld [vmem:[%s1117_s29 + $0x28] sm:$0xff]  ;;  %v251_v29 = vld [vmem:[%s1117_s29 + $0x20] sm:$0xff]  ;;  %s238_s18 = scalar_lea.vmem [#allocation9], %s619_s8  ;;  %s1162_s27 = scalar_lea.hbm %s1214_s3, %s635_s5 }
  0x6c   : > { %363 = vmatprep.subr.bf16.mxu1 %v280_v3  ;;  %v284_v14 = vunpack.c.l.s8.bf16 %v250_v10  ;;  %v316_v15 = vunpack.c.l.s8.bf16 %v266_v11  ;;  %v265_v17 = vld [vmem:[%s1117_s29 + $0x90] sm:$0xff]  ;;  %v283_v18 = vunpack.c.l.s8.bf16 %v249_v16  ;;  %v286_v20 = vunpack.c.h.s8.bf16 %v250_v10  ;;  %v268_v23 = vld [vmem:[%s1117_s29 + $0xa8] sm:$0xff]  ;;  %v267_v30 = vld [vmem:[%s1117_s29 + $0xa0] sm:$0xff]  ;;  %s496_s30 = sshll.u32 %s238_s18, 4  ;;  %s480_s28 = scalar_lea.sflag [#allocation4], %s1113_s26  ;;  %s1157_s30 = int_to_ptr.vmem [resolvable:$true] %s496_s30 }
  0x6d   : > { %406 = vmatprep.subr.bf16.mxu0 %v312_v5  ;;  %364 = vmatpush1.bf16.msra.mxu1 %v279_v8  ;;  %v315_v19 = vunpack.c.l.s8.bf16 %v265_v17  ;;  %v318_v21 = vunpack.c.h.s8.bf16 %v266_v11  ;;  %v731_v24 = vld [vmem:[#allocation6 + $0x4] ss:$16 sps:$4 sm:$0xff]   ;;  %v285_v25 = vunpack.c.h.s8.bf16 %v249_v16  ;;  %v317_v26 = vunpack.c.h.s8.bf16 %v265_v17  ;;  %v734_v31 = vld [vmem:[#allocation6 + $0xc] ss:$16 sps:$4 sm:$0xff]   ;;  %s806_s4 = scalar_lea.vmem %s1157_s30, 256  ;;  %p1231_p4 = scmp.ne.s32.totalorder %s1222_s23, 0 }
  0x6e   : > { %407 = vmatpush1.bf16.msra.mxu0 %v311_v9  ;;  %365 = vmatprep.subr.bf16.mxu1 %v282_v4  ;;  %v288_v27 = vunpack.c.l.s8.bf16 %v252_v22  ;;  %v320_v28 = vunpack.c.l.s8.bf16 %v268_v23  ;;  %v287_v32 = vunpack.c.l.s8.bf16 %v251_v29  ;;  %v319_v33 = vunpack.c.l.s8.bf16 %v267_v30  ;;  %v254_v36 = vld [vmem:[%s1117_s29 + $0x38] sm:$0xff]  ;;  %v253_v42 = vld [vmem:[%s1117_s29 + $0x30] sm:$0xff]  ;;  %v256_v48 = vld [vmem:[%s1117_s29 + $0x48] sm:$0xff]  ;;  %p807_p13 = scmp.ne.s32.totalorder %s1157_s30, %s806_s4  ;;  %s904_s15 = smov [#allocation9]  }
  0x6f   : > { %408 = vmatprep.subr.bf16.mxu0 %v314_v6  ;;  %395 = vmatprep.mubr.bf16.mxu1 %v731_v24  ;;  %v290_v34 = vunpack.c.h.s8.bf16 %v252_v22  ;;  %v322_v35 = vunpack.c.h.s8.bf16 %v268_v23  ;;  %v270_v37 = vld [vmem:[%s1117_s29 + $0xb8] sm:$0xff]  ;;  %v289_v38 = vunpack.c.h.s8.bf16 %v251_v29  ;;  %v321_v39 = vunpack.c.h.s8.bf16 %v267_v30  ;;  %v269_v43 = vld [vmem:[%s1117_s29 + $0xb0] sm:$0xff]  ;;  %v272_v49 = vld [vmem:[%s1117_s29 + $0xc8] sm:$0xff]  ;;  %s810_s9 = sshll.u32 %s904_s15, 4  ;;  %s811_s9 = int_to_ptr.vmem [resolvable:$false] %s810_s9 }
  0x70   : > { %438 = vmatprep.mubr.bf16.mxu0 %v734_v31  ;;  %v292_v40 = vunpack.c.l.s8.bf16 %v254_v36  ;;  %v324_v41 = vunpack.c.l.s8.bf16 %v270_v37  ;;  %v291_v44 = vunpack.c.l.s8.bf16 %v253_v42  ;;  %v323_v45 = vunpack.c.l.s8.bf16 %v269_v43  ;;  %v255_v54 = vld [vmem:[%s1117_s29 + $0x40] sm:$0xff]  ;;  %v258_v60 = vld [vmem:[%s1117_s29 + $0x58] sm:$0xff]  ;;  %v257_v2 = vld [vmem:[%s1117_s29 + $0x50] sm:$0xff]  ;;  %p808_p11 = pnand %p807_p13, %p1231_p4  ;;  %s812_s6 = scalar_lea.vmem %s811_s9, 512 }
  0x71   : > { %366 = vmatpush1.bf16.msra.mxu1 %v281_v12  ;;  %v294_v46 = vunpack.c.h.s8.bf16 %v254_v36  ;;  %v326_v47 = vunpack.c.h.s8.bf16 %v270_v37  ;;  %v293_v50 = vunpack.c.h.s8.bf16 %v253_v42  ;;  %v325_v51 = vunpack.c.h.s8.bf16 %v269_v43  ;;  %v271_v55 = vld [vmem:[%s1117_s29 + $0xc0] sm:$0xff]  ;;  %v274_v61 = vld [vmem:[%s1117_s29 + $0xd8] sm:$0xff]  ;;  %v273_v3 = vld [vmem:[%s1117_s29 + $0xd0] sm:$0xff]  ;;  %p813_p0 = scmp.lt.s32.totalorder %s1157_s30, %s811_s9  ;;  %p814_p8 = scmp.lt.s32.totalorder %s812_s6, %s806_s4 }
  0x72   : > { %409 = vmatpush1.bf16.msra.mxu0 %v313_v13  ;;  %367 = vmatprep.subr.bf16.mxu1 %v284_v14  ;;  %v296_v52 = vunpack.c.l.s8.bf16 %v256_v48  ;;  %v328_v53 = vunpack.c.l.s8.bf16 %v272_v49  ;;  %v295_v56 = vunpack.c.l.s8.bf16 %v255_v54  ;;  %v327_v57 = vunpack.c.l.s8.bf16 %v271_v55  ;;  %v260_v8 = vld [vmem:[%s1117_s29 + $0x68] sm:$0xff]  ;;  %v259_v14 = vld [vmem:[%s1117_s29 + $0x60] sm:$0xff]  ;;  %p809_p1 = pneg %p808_p11 }
  0x73   : > { %410 = vmatprep.subr.bf16.mxu0 %v316_v15  ;;  %v298_v58 = vunpack.c.h.s8.bf16 %v256_v48  ;;  %v330_v59 = vunpack.c.h.s8.bf16 %v272_v49  ;;  %v297_v62 = vunpack.c.h.s8.bf16 %v255_v54  ;;  %v329_v63 = vunpack.c.h.s8.bf16 %v271_v55  ;;  %v276_v9 = vld [vmem:[%s1117_s29 + $0xe8] sm:$0xff]  ;;  %v275_v15 = vld [vmem:[%s1117_s29 + $0xe0] sm:$0xff]  ;;  %p815_p9 = por %p814_p8, %p813_p0 }
  0x74   : > { %v300_v0 = vunpack.c.l.s8.bf16 %v258_v60  ;;  %v332_v1 = vunpack.c.l.s8.bf16 %v274_v61  ;;  %v299_v4 = vunpack.c.l.s8.bf16 %v257_v2  ;;  %v331_v5 = vunpack.c.l.s8.bf16 %v273_v3 }
  0x75   : > { %368 = vmatpush1.bf16.msra.mxu1 %v283_v18  ;;  %v302_v6 = vunpack.c.h.s8.bf16 %v258_v60  ;;  %v334_v7 = vunpack.c.h.s8.bf16 %v274_v61  ;;  %v301_v10 = vunpack.c.h.s8.bf16 %v257_v2  ;;  %v333_v11 = vunpack.c.h.s8.bf16 %v273_v3  ;;  %p816_p12 = pnand %p815_p9, %p809_p1 }
  0x76   : > { %411 = vmatpush1.bf16.msra.mxu0 %v315_v19  ;;  %369 = vmatprep.subr.bf16.mxu1 %v286_v20  ;;  %v304_v12 = vunpack.c.l.s8.bf16 %v260_v8  ;;  %v336_v13 = vunpack.c.l.s8.bf16 %v276_v9  ;;  %v303_v16 = vunpack.c.l.s8.bf16 %v259_v14  ;;  %v335_v17 = vunpack.c.l.s8.bf16 %v275_v15  ;;  %v262_v20 = vld [vmem:[%s1117_s29 + $0x78] sm:$0xff] }
  0x77   : > { %412 = vmatprep.subr.bf16.mxu0 %v318_v21  ;;  %v306_v18 = vunpack.c.h.s8.bf16 %v260_v8  ;;  %v338_v19 = vunpack.c.h.s8.bf16 %v276_v9  ;;  %v278_v21 = vld [vmem:[%s1117_s29 + $0xf8] sm:$0xff]  ;;  %v305_v22 = vunpack.c.h.s8.bf16 %v259_v14  ;;  %v337_v23 = vunpack.c.h.s8.bf16 %v275_v15 }
  0x78   : > { %v308_v24 = vunpack.c.l.s8.bf16 %v262_v20  ;;  %v310_v30 = vunpack.c.h.s8.bf16 %v262_v20  ;;  %v342_v31 = vunpack.c.h.s8.bf16 %v278_v21  ;;  %v456_v42 = vstv %s624_s22 }
  0x79   : > { %370 = vmatpush1.bf16.msra.mxu1 %v285_v25  ;;  %v340_v25 = vunpack.c.l.s8.bf16 %v278_v21 }
  0x7a   : > { %413 = vmatpush1.bf16.msra.mxu0 %v317_v26  ;;  %371 = vmatprep.subr.bf16.mxu1 %v288_v27  ;;  %v261_v26 = vld [vmem:[%s1117_s29 + $0x70] sm:$0xff] }
  0x7b   : > { %414 = vmatprep.subr.bf16.mxu0 %v320_v28  ;;  %v277_v27 = vld [vmem:[%s1117_s29 + $0xf0] sm:$0xff]  ;;  %v307_v28 = vunpack.c.l.s8.bf16 %v261_v26 }
  0x7c   : > { %v339_v29 = vunpack.c.l.s8.bf16 %v277_v27 }
  0x7d   : > { %372 = vmatpush1.bf16.msra.mxu1 %v287_v32  ;;  %v309_v32 = vunpack.c.h.s8.bf16 %v261_v26 }
  0x7e   : > { %415 = vmatpush1.bf16.msra.mxu0 %v319_v33  ;;  %373 = vmatprep.subr.bf16.mxu1 %v290_v34  ;;  %v341_v33 = vunpack.c.h.s8.bf16 %v277_v27  ;;  %v729_v34 = vld [vmem:[#allocation6] ss:$16 sps:$4 sm:$0xff]  }
  0x7f   : > { %416 = vmatprep.subr.bf16.mxu0 %v322_v35  ;;  %v732_v35 = vld [vmem:[#allocation6 + $0x8] ss:$16 sps:$4 sm:$0xff]  }
  0x81   : > { %374 = vmatpush1.bf16.msra.mxu1 %v289_v38  ;;  %v450_v38 = vstv %s449_s21 }
  0x82   : > { %417 = vmatpush1.bf16.msra.mxu0 %v321_v39  ;;  %375 = vmatprep.subr.bf16.mxu1 %v292_v40 }
  0x83   : > { %418 = vmatprep.subr.bf16.mxu0 %v324_v41 }
  0x85   : > { %376 = vmatpush1.bf16.msra.mxu1 %v291_v44 }
  0x86   : > { %419 = vmatpush1.bf16.msra.mxu0 %v323_v45  ;;  %377 = vmatprep.subr.bf16.mxu1 %v294_v46 }
  0x87   : > { %420 = vmatprep.subr.bf16.mxu0 %v326_v47 }
  0x89   : > { %378 = vmatpush1.bf16.msra.mxu1 %v293_v50 }
  0x8a   : > { %421 = vmatpush1.bf16.msra.mxu0 %v325_v51  ;;  %379 = vmatprep.subr.bf16.mxu1 %v296_v52 }
  0x8b   : > { %422 = vmatprep.subr.bf16.mxu0 %v328_v53 }
  0x8d   : > { %380 = vmatpush1.bf16.msra.mxu1 %v295_v56 }
  0x8e   : > { %423 = vmatpush1.bf16.msra.mxu0 %v327_v57  ;;  %381 = vmatprep.subr.bf16.mxu1 %v298_v58 }
  0x8f   : > { %424 = vmatprep.subr.bf16.mxu0 %v330_v59 }
  0x91   : > { %382 = vmatpush1.bf16.msra.mxu1 %v297_v62 }
  0x92   : > { %425 = vmatpush1.bf16.msra.mxu0 %v329_v63  ;;  %383 = vmatprep.subr.bf16.mxu1 %v300_v0 }
  0x93   : > { %426 = vmatprep.subr.bf16.mxu0 %v332_v1 }
  0x95   : > { %384 = vmatpush1.bf16.msra.mxu1 %v299_v4 }
  0x96   : > { %427 = vmatpush1.bf16.msra.mxu0 %v331_v5  ;;  %385 = vmatprep.subr.bf16.mxu1 %v302_v6 }
  0x97   : > { %428 = vmatprep.subr.bf16.mxu0 %v334_v7 }
  0x99   : > { %386 = vmatpush1.bf16.msra.mxu1 %v301_v10 }
  0x9a   : > { %429 = vmatpush1.bf16.msra.mxu0 %v333_v11  ;;  %387 = vmatprep.subr.bf16.mxu1 %v304_v12 }
  0x9b   : > { %430 = vmatprep.subr.bf16.mxu0 %v336_v13 }
  0x9d   : > { %388 = vmatpush1.bf16.msra.mxu1 %v303_v16 }
  0x9e   : > { %431 = vmatpush1.bf16.msra.mxu0 %v335_v17  ;;  %389 = vmatprep.subr.bf16.mxu1 %v306_v18 }
  0x9f   : > { %432 = vmatprep.subr.bf16.mxu0 %v338_v19 }
  0xa1   : > { %390 = vmatpush1.bf16.msra.mxu1 %v305_v22 }
  0xa2   : > { %433 = vmatpush1.bf16.msra.mxu0 %v337_v23  ;;  %391 = vmatprep.subr.bf16.mxu1 %v308_v24 }
  0xa3   : > { %434 = vmatprep.subr.bf16.mxu0 %v340_v25 }
  0xa5   : > { %392 = vmatpush1.bf16.msra.mxu1 %v307_v28 }
  0xa6   : > { %435 = vmatpush1.bf16.msra.mxu0 %v339_v29  ;;  %393 = vmatprep.subr.bf16.mxu1 %v310_v30 }
  0xa7   : > { %436 = vmatprep.subr.bf16.mxu0 %v342_v31 }
  0xa9   : > { %394 = vmatpush1.bf16.msra.mxu1 %v309_v32 }
  0xaa   : > { %437 = vmatpush1.bf16.msra.mxu0 %v341_v33 }
  0xac   : > { %396 = vmatmul.mubr.bf16.vlgmr.msra.gmra.mrb[0].mxu1 %v729_v34 }
  0xad   : > { %439 = vmatmul.mubr.bf16.vlgmr.msra.gmra.mrb[0].mxu0 %v732_v35 }
 0x17f   : > { %v397_v36 = vpop.f32.mrb[0].mxu1 }
 0x180   : > { %v440_v37 = vpop.f32.mrb[0].mxu0  ;;  %v399_v40 = vpop.f32.mrb[1].mxu1 }
 0x181   : > { %v441_v39 = vadd.f32 %v440_v37, %v397_v36  ;;  %v442_v41 = vpop.f32.mrb[1].mxu0  ;;  %v401_v44 = vpop.f32.mrb[2].mxu1 }
 0x182   : > { %v443_v43 = vadd.f32 %v442_v41, %v399_v40  ;;  %v444_v45 = vpop.f32.mrb[2].mxu0  ;;  %v403_v48 = vpop.f32.mrb[3].mxu1 }
 0x183   : > { %v451_v46 = vmul.f32 %v450_v38, %v441_v39  ;;  %v445_v47 = vadd.f32 %v444_v45, %v401_v44  ;;  %v446_v49 = vpop.f32.mrb[3].mxu0 }
 0x184   : > { %v452_v50 = vmul.f32 %v450_v38, %v443_v43  ;;  %v447_v51 = vadd.f32 %v446_v49, %v403_v48 }
 0x185   : > { %v457_v52 = vadd.f32 %v456_v42, %v451_v46  ;;  %v453_v53 = vmul.f32 %v450_v38, %v445_v47 }
 0x186   : > { %v458_v54 = vadd.f32 %v456_v42, %v452_v50  ;;  %v454_v55 = vmul.f32 %v450_v38, %v447_v51 }
 0x187   : > { %v461_v56 = vmax.f32 %v457_v52, 0.0  ;;  %v459_v57 = vadd.f32 %v456_v42, %v453_v53 }
 0x188   : > { %v462_v58 = vmax.f32 %v458_v54, 0.0  ;;  %v460_v59 = vadd.f32 %v456_v42, %v454_v55 }
 0x189   : > { %v463_v60 = vmax.f32 %v459_v57, 0.0 }
 0x18a   : > { %v633_v61 = vpack.c.bf16 %v462_v58, %v461_v56  ;;  %v464_v62 = vmax.f32 %v460_v59, 0.0 }
 0x18c   : > { %477 = vst [vmem:[%s238_s18] sm:$0xff] %v633_v61  ;;  %v634_v63 = vpack.c.bf16 %v464_v62, %v463_v60 }
 0x18e   : > { %478 = vst [vmem:[%s238_s18 + $0x8] sm:$0xff] %v634_v63 }
 0x18f   : > { %819 = shalt.err (!%p816_p12)
}
 0x190   : > { %s820_s25 = scalar_lea.hbm %s1162_s27, 256  ;;  %s824_s21 = scalar_lea.hbm %s1214_s3, 512 }
 0x191   : > { %p821_p5 = scmp.ne.s32.totalorder %s1162_s27, %s820_s25  ;;  %p825_p10 = scmp.lt.u32.totalorder %s1162_s27, %s1214_s3 }
 0x192   : > { %p826_p2 = scmp.lt.u32.totalorder %s824_s21, %s820_s25  ;;  %p828_p13 = scmp.lt.u32.totalorder %s820_s25, %s1162_s27 }
 0x193   : > { %p822_p3 = pnand %p821_p5, %p1231_p4 }
 0x194   : > { %p827_p7 = por %p826_p2, %p825_p10 }
 0x195   : > { %p823_p6 = pneg %p822_p3 }
 0x196   : > { %p829_p11 = por %p828_p13, %p827_p7 }
 0x198   : > { %p830_p1 = pnand %p829_p11, %p823_p6 }
 0x19a   : > { %833 = shalt.err (!%p830_p1)
}
 0x19b   : > { %s905_s18 = smov 128   ;;  %s906_s5 = smov 256  }
 0x19c   : > { %s907_s7 = smov 8  }
 0x19d   : > { %650 = dma.vmem_to_hbm [thread:$0]  (%p1231_p4), %s1157_s30, 256, %s1162_s27, %s480_s28, %s905_s18, %s906_s5, %s907_s7  }
 0x19e PF: > { %s511_s20 = sand.u32 1, %s876_s12   ;;  %p1232_p0 = scmp.ne.s32.totalorder %s1223_s24, 0 }
 0x19f   : > { %p1233_p8 = scmp.ge.s32.totalorder %s896_s17, 2  ;;  %s512_s4 = scalar_lea.sflag [#allocation4], %s511_s20 }
 0x1a1   : > { %p664_p9 = pnand %p1233_p8, %p1232_p0 }
 0x1a3   : > { %871 = dma.done.wait (!%p664_p9), %s512_s4, 256  }
 0x1a4   : > { %873 = vsyncadd (!%p664_p9), %s512_s4, 4294967040  ;;  %s21_s17 = sadd.s32 1, %s896_s17   ;;  %s1234_s12 = smov %s880_s13 }
 0x1a5   : > { %p18_p12 = scmp.ge.s32.totalorder %s21_s17, 4   ;;  %s1235_s13 = smov %s884_s14 }
 0x1a6   : > { %s1236_s14 = smov %s1070_s11  ;;  %s1237_s15 = smov %s892_s16 }
 0x1a7   : > { %s1238_s16 = smov %s1240_s19  ;;  %20 = sbr.rel (!%p18_p12) target bundleno = 8 (0x8), region = 88 }
 0x1ae   :  { %517 = vsyncpa [#allocation3], 1 }
 0x1af   :  { %519 = vsyncpa [#allocation3 + $0x1], 1 }
 0x1b0   :  { %520 = vsyncpa [#allocation8], 1 }
 0x1b1   :  { %522 = vsyncpa [#allocation8 + $0x1], 1 }
 0x1b2   :  { %523 = vsyncpa [#allocation4], 1 }
 0x1b3   :  { %525 = vsyncpa [#allocation4 + $0x1], 1 }
 0x1b4   :  { %526 = vsyncpa [#allocation5], 1 }
 0x1b5   :  { %528 = vsyncpa [#allocation5 + $0x1], 1 }

</bundles_post_ra>
